<compile_context>
chip_gen: v7x
topology: tpu7x:2x2x1
jax: 0.10.0
libtpu: 0.0.40
codegen_flags: <defaults>
</compile_context>

<pallas_src>
import functools

import jax
import jax.numpy as jnp
from jax.experimental import pallas as pl
from jax.experimental.pallas import tpu as pltpu


def _round_up(a, b):
    return (a + b - 1) // b * b


def _cdiv(a, b):
    return (a + b - 1) // b


# ----------------------------------------------------------------------------
# Pallas kernel: lane-dense (channels x points) fused-embed -> MLP -> residual
# ----------------------------------------------------------------------------
def _poly_head_kernel(polyT_ref, cpk_ref, w2T_ref, w3b_ref, out_ref, *,
                      W, max_offsets, mm_dtype):
    C = w3b_ref.shape[1] - 1
    polyT = polyT_ref[...]                                    # (2, TR) f32

    # norm = (poly / W - 0.5) * 2  ==  poly * (2/W) - 1   (single VPU FMA)
    normT = polyT * (2.0 / W) - 1.0

    cpk = cpk_ref[...]                                        # (C, 4) f32
    wx, wy = cpk[:, 0:1], cpk[:, 1:2]                         # columns of we @ w1
    b1f, b2 = cpk[:, 2:3], cpk[:, 3:4]                        # be @ w1 + b1 ; b2

    # poly_embed (Linear 2->C) fused into reg-head layer 1 (no nonlinearity in
    # between): h1 = relu(norm @ (we@w1) + (be@w1 + b1)) -> two VPU FMAs, no
    # MXU pass and no separate feat tensor.
    h1 = jnp.maximum(wx * normT[0:1, :] + wy * normT[1:2, :] + b1f, 0.0)  # (C, TR)

    # TODO(synk): grid_sample(mask_feat), cnn_1d, positional_encoding and the
    # mmcv transformer decoder layers sit between poly_embed and the reg head
    # in the full model; they are constructed outside this module's code and
    # are omitted (query_feat == poly_feat here) — which is what makes the
    # embed/layer-1 fusion above valid.

    # Remaining reg-head layers: one CxC MXU matmul (+ReLU) and a tiny (2,C)
    # matmul, all with f32 accumulation.  Single operand cast for the bf16 path.
    h2 = jnp.dot(w2T_ref[...], h1.astype(mm_dtype),
                 preferred_element_type=jnp.float32) + b2                 # (C, TR)
    h2 = jnp.maximum(h2, 0.0)

    w3b = w3b_ref[...]                                        # (2, C+1) f32
    regT = jnp.dot(w3b[:, :C], h2,
                   preferred_element_type=jnp.float32) + w3b[:, C:]      # (2, TR)

    # prim_pred_reg = clamp(poly + reg * max_offsets, 0, W)
    predT = jnp.clip(polyT + regT * max_offsets, 0.0, W)

    # prim_pred_reg[(poly < 0).all(-1)] = -1  (elementwise AND, no x-lane reduce)
    invalid = (polyT[0:1, :] < 0.0) & (polyT[1:2, :] < 0.0)
    out_ref[...] = jnp.where(invalid, -1.0, predT)


# ----------------------------------------------------------------------------
# Host-side helpers
# ----------------------------------------------------------------------------
def _derive_tiling(rows, feat_channels, *, target_steps=2):
    # Budget ~8 MiB of f32 (C, tile) intermediates so default scoped VMEM is a
    # non-issue on v5e/v6e/v7x; within that, aim for >= target_steps grid steps
    # (both v7x TensorCores) with at most ~16K lanes per step.
    max_tile = max(2048, min(16384, (8 << 20) // (4 * max(feat_channels, 32))))
    tr = _round_up(max(_cdiv(rows, target_steps), 128), 128)
    tr = min(tr, max_tile)
    padded = _round_up(rows, tr)
    return tr, padded


def _fuse_and_pack_params(params, matmul_dtype):
    C = params["w2"].shape[0]
    hi = jax.lax.Precision.HIGHEST
    we_f = jnp.matmul(params["we"], params["w1"], precision=hi)            # (2, C)
    b1_f = jnp.matmul(params["be"], params["w1"], precision=hi) + params["b1"]
    cpk = jnp.concatenate(
        [we_f.T, b1_f.reshape(C, 1), params["b2"].reshape(C, 1)], axis=1
    ).astype(jnp.float32)                                                  # (C, 4)
    w2T = params["w2"].T.astype(matmul_dtype)                              # (C, C)
    w3b = jnp.concatenate(
        [params["w3"].T, params["b3"].reshape(2, 1)], axis=1
    ).astype(jnp.float32)                                                  # (2, C+1)
    return cpk, w2T, w3b


def forward_poly_pallas_T(polyT, params, *, W, max_offsets,
                          matmul_dtype=jnp.bfloat16):
    """Copy-free hot path.  polyT: (2, R) f32 with points on the lane axis
    (invalid points marked with coords < 0).  Returns (2, R).  Producers that
    emit/keep this layout avoid the transpose HBM round-trips done by
    `forward_poly_pallas`."""
    _, R = polyT.shape
    C = params["w2"].shape[0]
    tr, padded = _derive_tiling(R, C)
    if padded != R:
        polyT = jnp.pad(polyT, ((0, 0), (0, padded - R)), constant_values=-1.0)
    grid = padded // tr

    cpk, w2T, w3b = _fuse_and_pack_params(params, matmul_dtype)

    kernel = functools.partial(_poly_head_kernel, W=float(W),
                               max_offsets=float(max_offsets),
                               mm_dtype=matmul_dtype)

    outT = pl.pallas_call(
        kernel,
        out_shape=jax.ShapeDtypeStruct((2, padded), jnp.float32),
        grid_spec=pltpu.PrefetchScalarGridSpec(
            num_scalar_prefetch=0,
            grid=(grid,),
            in_specs=[
                pl.BlockSpec((2, tr), lambda i: (0, i)),        # poly tile (lane-dense)
                pl.BlockSpec((C, 4), lambda i: (0, 0)),         # [we@w1 | be@w1+b1 | b2]
                pl.BlockSpec((C, C), lambda i: (0, 0)),         # w2^T (MXU dtype)
                pl.BlockSpec((2, C + 1), lambda i: (0, 0)),     # [w3^T | b3]
            ],
            out_specs=pl.BlockSpec((2, tr), lambda i: (0, i)),
        ),
        compiler_params=pltpu.CompilerParams(
            dimension_semantics=("parallel",)),
    )(polyT, cpk, w2T, w3b)

    return outT if padded == R else outT[:, :R]


def forward_poly_pallas(poly_pred, params, *, W, max_offsets,
                        matmul_dtype=jnp.bfloat16):
    """poly_pred: (K, N, 2) f32.  Returns prim_reg_pred of the same shape
    (DPPolygonizer.forward_poly tensor hot-path semantics)."""
    K, N, _ = poly_pred.shape
    rows = K * N
    # TODO(synk): upstream producers should emit/keep the (2, K*N) layout and
    # call forward_poly_pallas_T directly; the transposes here/below are extra
    # XLA HBM round-trips at these byte counts.
    polyT = poly_pred.reshape(rows, 2).astype(jnp.float32).T
    outT = forward_poly_pallas_T(polyT, params, W=W, max_offsets=max_offsets,
                                 matmul_dtype=matmul_dtype)
    return outT.T.reshape(K, N, 2)


# ----------------------------------------------------------------------------
# Pure-JAX reference (same math, un-fused params) for verification
# ----------------------------------------------------------------------------
def forward_poly_ref(poly_pred, p, *, W, max_offsets):
    norm = (poly_pred / W - 0.5) * 2.0
    feat = norm @ p["we"] + p["be"]
    h = jnp.maximum(feat @ p["w1"] + p["b1"], 0.0)
    h = jnp.maximum(h @ p["w2"] + p["b2"], 0.0)
    reg = h @ p["w3"] + p["b3"]
    pred = jnp.clip(poly_pred + reg * max_offsets, 0.0, W)
    invalid = jnp.all(poly_pred < 0.0, axis=-1, keepdims=True)
    return jnp.where(invalid, -1.0, pred)


# ----------------------------------------------------------------------------
# Deterministic parameter / input construction
# ----------------------------------------------------------------------------
def make_params(key, feat_channels):
    C = feat_channels
    ks = jax.random.split(key, 8)
    s = 0.1
    return dict(
        we=jax.random.normal(ks[0], (2, C), jnp.float32) * s,
        be=jax.random.normal(ks[1], (1, C), jnp.float32) * s,
        w1=jax.random.normal(ks[2], (C, C), jnp.float32) * s,
        b1=jax.random.normal(ks[3], (1, C), jnp.float32) * s,
        w2=jax.random.normal(ks[4], (C, C), jnp.float32) * s,
        b2=jax.random.normal(ks[5], (1, C), jnp.float32) * s,
        w3=jax.random.normal(ks[6], (C, 2), jnp.float32) * s,
        b3=jax.random.normal(ks[7], (1, 2), jnp.float32) * s,
    )


# TODO(synk): rasterio rasterization, shapely polygon IoU, ring/segment
# sampling, the DP ring decoding, the Hungarian assigner / target building and
# the dice/SmoothL1/angle losses in DPPolygonizer.loss are CPU / geometry code
# with no Pallas equivalent and are not implemented here.

if __name__ == "__main__":
    K, N, C = 3, 96, 32         # num polygons, num_inter_points, feat_channels
    W_img = 64.0                # image size used for normalization
    max_offsets = 10.0          # poly_cfg['max_offsets']

    key = jax.random.PRNGKey(0)
    k_poly, k_par = jax.random.split(key)

    # sampled_segments-like input: coords in [0, W); mark the last 5 points of
    # the second polygon as invalid (all coords < 0), as sample_segments does.
    poly_pred = jax.random.uniform(k_poly, (K, N, 2), jnp.float32,
                                   minval=0.0, maxval=W_img)
    poly_pred = poly_pred.at[1, -5:, :].set(-1.0)

    params = make_params(k_par, C)

    ref = forward_poly_ref(poly_pred, params, W=W_img, max_offsets=max_offsets)

    # f32 MXU-operand path (correctness baseline).
    out_f32 = forward_poly_pallas(poly_pred, params, W=W_img,
                                  max_offsets=max_offsets,
                                  matmul_dtype=jnp.float32)
    out_f32 = jax.block_until_ready(out_f32)
    assert out_f32.shape == (K, N, 2)
    assert jnp.allclose(out_f32, ref, atol=2e-3, rtol=1e-3), "f32 mismatch vs ref"

    # Default path: bf16 MXU operands, f32 accumulation (fast on all gens).
    out_bf16 = forward_poly_pallas(poly_pred, params, W=W_img,
                                   max_offsets=max_offsets)
    out_bf16 = jax.block_until_ready(out_bf16)
    assert float(jnp.max(jnp.abs(out_bf16 - ref))) < 0.5, "bf16 mismatch vs ref"

    print("KERNEL_OK")
</pallas_src>

<mosaic_0001>
module attributes {stable_mosaic.version = 11 : i64} {
  func.func @_poly_head_kernel(%arg0: i32, %arg1: memref<2x256xf32, #tpu.memory_space<vmem>>, %arg2: memref<32x4xf32, #tpu.memory_space<vmem>>, %arg3: memref<32x32xf32, #tpu.memory_space<vmem>>, %arg4: memref<2x33xf32, #tpu.memory_space<vmem>>, %arg5: memref<2x256xf32, #tpu.memory_space<vmem>>) attributes {dimension_semantics = [#tpu.dimension_semantics<parallel>], iteration_bounds = array<i64: 2>, scalar_prefetch = 0 : i64, scratch_operands = 0 : i64, tpu.core_type = #tpu.core_type<tc>, window_params = [{transform_indices = @transform_0, window_bounds = array<i64: 2, 256>}, {pipeline_mode = #tpu.pipeline_mode<synchronous>, transform_indices = @transform_1, window_bounds = array<i64: 32, 4>}, {pipeline_mode = #tpu.pipeline_mode<synchronous>, transform_indices = @transform_2, window_bounds = array<i64: 32, 32>}, {pipeline_mode = #tpu.pipeline_mode<synchronous>, transform_indices = @transform_3, window_bounds = array<i64: 2, 33>}, {transform_indices = @transform_4, window_bounds = array<i64: 2, 256>}]} {
    %c0 = arith.constant 0 : index
    %c0_0 = arith.constant 0 : index
    %0 = vector.load %arg1[%c0, %c0_0] : memref<2x256xf32, #tpu.memory_space<vmem>>, vector<2x256xf32>
    %cst = arith.constant 3.125000e-02 : f32
    %1 = vector.broadcast %cst : f32 to vector<2x256xf32>
    %2 = arith.mulf %0, %1 : vector<2x256xf32>
    %cst_1 = arith.constant 1.000000e+00 : f32
    %3 = vector.broadcast %cst_1 : f32 to vector<2x256xf32>
    %4 = arith.subf %2, %3 : vector<2x256xf32>
    %c0_2 = arith.constant 0 : index
    %c0_3 = arith.constant 0 : index
    %5 = vector.load %arg2[%c0_2, %c0_3] : memref<32x4xf32, #tpu.memory_space<vmem>>, vector<32x4xf32>
    %6 = vector.extract_strided_slice %5 {offsets = [0, 0], sizes = [32, 1], strides = [1, 1]} : vector<32x4xf32> to vector<32x1xf32>
    %7 = vector.extract_strided_slice %5 {offsets = [0, 1], sizes = [32, 1], strides = [1, 1]} : vector<32x4xf32> to vector<32x1xf32>
    %8 = vector.extract_strided_slice %5 {offsets = [0, 2], sizes = [32, 1], strides = [1, 1]} : vector<32x4xf32> to vector<32x1xf32>
    %9 = vector.extract_strided_slice %5 {offsets = [0, 3], sizes = [32, 1], strides = [1, 1]} : vector<32x4xf32> to vector<32x1xf32>
    %10 = vector.extract_strided_slice %4 {offsets = [0, 0], sizes = [1, 256], strides = [1, 1]} : vector<2x256xf32> to vector<1x256xf32>
    %11 = vector.broadcast %6 : vector<32x1xf32> to vector<32x256xf32>
    %12 = vector.broadcast %10 : vector<1x256xf32> to vector<32x256xf32>
    %13 = arith.mulf %11, %12 : vector<32x256xf32>
    %14 = vector.extract_strided_slice %4 {offsets = [1, 0], sizes = [1, 256], strides = [1, 1]} : vector<2x256xf32> to vector<1x256xf32>
    %15 = vector.broadcast %7 : vector<32x1xf32> to vector<32x256xf32>
    %16 = vector.broadcast %14 : vector<1x256xf32> to vector<32x256xf32>
    %17 = arith.mulf %15, %16 : vector<32x256xf32>
    %18 = arith.addf %13, %17 : vector<32x256xf32>
    %19 = vector.broadcast %8 : vector<32x1xf32> to vector<32x256xf32>
    %20 = arith.addf %18, %19 : vector<32x256xf32>
    %cst_4 = arith.constant 0.000000e+00 : f32
    %21 = vector.broadcast %cst_4 : f32 to vector<32x256xf32>
    %22 = arith.maximumf %20, %21 : vector<32x256xf32>
    %c0_5 = arith.constant 0 : index
    %c0_6 = arith.constant 0 : index
    %23 = vector.load %arg3[%c0_5, %c0_6] : memref<32x32xf32, #tpu.memory_space<vmem>>, vector<32x32xf32>
    %cst_7 = arith.constant dense<0.000000e+00> : vector<32x256xf32>
    %24 = tpu.matmul %23, %22, %cst_7 {dimension_numbers = #tpu.dot_dimension_numbers<[1], [0], [0], [1], [0, 0, 1, 1], [], []>} : vector<32x32xf32>, vector<32x256xf32>, vector<32x256xf32> -> vector<32x256xf32>
    %25 = vector.broadcast %9 : vector<32x1xf32> to vector<32x256xf32>
    %26 = arith.addf %24, %25 : vector<32x256xf32>
    %cst_8 = arith.constant 0.000000e+00 : f32
    %27 = vector.broadcast %cst_8 : f32 to vector<32x256xf32>
    %28 = arith.maximumf %26, %27 : vector<32x256xf32>
    %c0_9 = arith.constant 0 : index
    %c0_10 = arith.constant 0 : index
    %29 = vector.load %arg4[%c0_9, %c0_10] : memref<2x33xf32, #tpu.memory_space<vmem>>, vector<2x33xf32>
    %30 = vector.extract_strided_slice %29 {offsets = [0, 0], sizes = [2, 32], strides = [1, 1]} : vector<2x33xf32> to vector<2x32xf32>
    %cst_11 = arith.constant dense<0.000000e+00> : vector<2x256xf32>
    %31 = tpu.matmul %30, %28, %cst_11 {dimension_numbers = #tpu.dot_dimension_numbers<[1], [0], [0], [1], [0, 0, 1, 1], [], []>} : vector<2x32xf32>, vector<32x256xf32>, vector<2x256xf32> -> vector<2x256xf32>
    %32 = vector.extract_strided_slice %29 {offsets = [0, 32], sizes = [2, 1], strides = [1, 1]} : vector<2x33xf32> to vector<2x1xf32>
    %33 = vector.broadcast %32 : vector<2x1xf32> to vector<2x256xf32>
    %34 = arith.addf %31, %33 : vector<2x256xf32>
    %cst_12 = arith.constant 1.000000e+01 : f32
    %35 = vector.broadcast %cst_12 : f32 to vector<2x256xf32>
    %36 = arith.mulf %34, %35 : vector<2x256xf32>
    %37 = arith.addf %0, %36 : vector<2x256xf32>
    %cst_13 = arith.constant 0.000000e+00 : f32
    %cst_14 = arith.constant 6.400000e+01 : f32
    %38 = vector.broadcast %cst_13 : f32 to vector<2x256xf32>
    %39 = arith.maximumf %38, %37 : vector<2x256xf32>
    %40 = vector.broadcast %cst_14 : f32 to vector<2x256xf32>
    %41 = arith.minimumf %40, %39 : vector<2x256xf32>
    %42 = vector.extract_strided_slice %0 {offsets = [0, 0], sizes = [1, 256], strides = [1, 1]} : vector<2x256xf32> to vector<1x256xf32>
    %cst_15 = arith.constant 0.000000e+00 : f32
    %43 = vector.broadcast %cst_15 : f32 to vector<1x256xf32>
    %44 = arith.cmpf olt, %42, %43 : vector<1x256xf32>
    %45 = vector.extract_strided_slice %0 {offsets = [1, 0], sizes = [1, 256], strides = [1, 1]} : vector<2x256xf32> to vector<1x256xf32>
    %cst_16 = arith.constant 0.000000e+00 : f32
    %46 = vector.broadcast %cst_16 : f32 to vector<1x256xf32>
    %47 = arith.cmpf olt, %45, %46 : vector<1x256xf32>
    %48 = arith.andi %44, %47 : vector<1x256xi1>
    %cst_17 = arith.constant -1.000000e+00 : f32
    %49 = vector.shape_cast %48 : vector<1x256xi1> to vector<1x256xi1>
    %50 = vector.broadcast %49 : vector<1x256xi1> to vector<2x256xi1>
    %51 = vector.broadcast %cst_17 : f32 to vector<2x256xf32>
    %52 = arith.select %50, %51, %41 : vector<2x256xi1>, vector<2x256xf32>
    %c0_18 = arith.constant 0 : index
    %c0_19 = arith.constant 0 : index
    %53 = vector.load %arg5[%c0_18, %c0_19] : memref<2x256xf32, #tpu.memory_space<vmem>>, vector<2x256xf32>
    tpu.vector_store %arg5[%c0_18, %c0_19], %52 {strides = array<i32>} : memref<2x256xf32, #tpu.memory_space<vmem>>, vector<2x256xf32>,
    return
  }
  func.func @transform_0(%arg0: i32) -> (i32, i32) {
    %c0_i32 = arith.constant 0 : i32
    %c0_i32_0 = arith.constant 0 : i32
    return %c0_i32, %arg0 : i32, i32
  }
  func.func @transform_1(%arg0: i32) -> (i32, i32) {
    %c0_i32 = arith.constant 0 : i32
    %c0_i32_0 = arith.constant 0 : i32
    %c0_i32_1 = arith.constant 0 : i32
    return %c0_i32, %c0_i32_0 : i32, i32
  }
  func.func @transform_2(%arg0: i32) -> (i32, i32) {
    %c0_i32 = arith.constant 0 : i32
    %c0_i32_0 = arith.constant 0 : i32
    %c0_i32_1 = arith.constant 0 : i32
    return %c0_i32, %c0_i32_0 : i32, i32
  }
  func.func @transform_3(%arg0: i32) -> (i32, i32) {
    %c0_i32 = arith.constant 0 : i32
    %c0_i32_0 = arith.constant 0 : i32
    %c0_i32_1 = arith.constant 0 : i32
    return %c0_i32, %c0_i32_0 : i32, i32
  }
  func.func @transform_4(%arg0: i32) -> (i32, i32) {
    %c0_i32 = arith.constant 0 : i32
    %c0_i32_0 = arith.constant 0 : i32
    return %c0_i32, %arg0 : i32, i32
  }
}

</mosaic_0001>

<bundles_post_ra>
// kernel: tpu_custom_call.1
= control target key start
LH: loop header
LB: loop body
LE: loop exit
PB: predicated region body
PF: predicated region fallthrough
CT: control target
= control target key end

     0   :  { %9 = vsyncpa [#allocation3], 0  ;;  %s1038_s0 = inlined_call_operand.vmem [shape: f32[2,512], index: 0, kind: input, shape index: {}]   ;;  %s1039_s1 = inlined_call_operand.vmem [shape: f32[32,4], index: 1, kind: input, shape index: {}]   ;;  %s1040_s2 = inlined_call_operand.vmem [shape: f32[32,32], index: 2, kind: input, shape index: {}]   ;;  %s1041_s3 = inlined_call_operand.vmem [shape: f32[2,33], index: 3, kind: input, shape index: {}]   ;;  %s1042_s4 = inlined_call_operand.hbm [shape: f32[2,512], index: 4, kind: output, shape index: {}]  }
   0x1   :  { %11 = vsyncpa [#allocation3 + $0x1], 0  ;;  %s875_s15 = smov 0   ;;  %s877_s16 = smov 0  }
   0x2   :  { %s879_s17 = smov 0   ;;  %s881_s18 = smov 0  }
   0x3 LB: > { %s896_s19 = sadd.s32 4294967295, %s840_s18   ;;  %s684_s20 = sadd.s32 4294967294, %s840_s18   ;;  %s840_s18 = sphi %s881_s18, %s1048_s18   ;;  %s836_s17 = sphi %s879_s17, %s1047_s17   ;;  %s832_s16 = sphi %s877_s16, %s1046_s16   ;;  %s828_s15 = sphi %s875_s15, %s1045_s15  }
   0x4   : > { %s900_s21 = sadd.s32 1, %s840_s18   ;;  %s113_s22 = sadd.s32 1, %s836_s17 }
   0x5   : > { %s110_s23 = ssub.s32 %s840_s18, %s900_s21  ;;  %p123_p0 = scmp.ne.s32.totalorder %s836_s17, %s832_s16 }
   0x6   : > { %p111_p1 = scmp.eq.s32.totalorder %s110_s23, 0  ;;  %p124_p2 = scmp.eq.s32.totalorder %s896_s19, 1 }
   0x7   : > { %p129_p3 = scmp.ne.s32.totalorder %s832_s16, %s828_s15  ;;  %p130_p4 = scmp.eq.s32.totalorder %s684_s20, 1 }
   0x8   : > { %s911_s24 = scalar_select %p111_p1, %s836_s17, %s113_s22  }
   0x9   : > { %p913_p5 = por %p124_p2, %p123_p0  ;;  %p917_p6 = por %p130_p4, %p129_p3 }
   0xa   : > { %p687_p7 = scmp.ge.s32.totalorder %s840_s18, 1  ;;  %p166_p8 = scmp.lt.s32.totalorder %s840_s18, 3 }
   0xc   : > { %p167_p9 = pnand %p687_p7, %p166_p8 }
   0xd   : > { %s689_s27 = sshll.u32 (!%p167_p9), %s896_s19, 1  ;;  %v202_v0 = vld [vmem:[%s1039_s1] sm:$0xff] (!%p167_p9)  ;;  %v842_v1 = vmov (!%p167_p9), 1   ;;  %v843_v2 = vmov (!%p167_p9), 0   ;;  %v203_v3 = vld [vmem:[%s1039_s1 + $0x8] sm:$0xff] (!%p167_p9)  ;;  %v227_v4 = vlaneseq (!%p167_p9)  ;;  %v204_v6 = vld [vmem:[%s1039_s1 + $0x10] sm:$0xff] (!%p167_p9) }
   0xe   : > { %170 = sbr.rel (%p167_p9) target bundleno = 663 (0x297), region = 36  ;;  %768 = vset.pattern.permute.xlu1 (!%p167_p9), %v842_v1  ;;  %767 = vset.pattern.permute.xlu0 (!%p167_p9), %v843_v2  ;;  %p193_p10 = scmp.lt.s32.totalorder (!%p167_p9), %s689_s27, 3  ;;  %v205_v7 = vld [vmem:[%s1039_s1 + $0x18] sm:$0xff] (!%p167_p9)  ;;  %v844_v14 = vmov (!%p167_p9), 2   ;;  %v845_v15 = vmov (!%p167_p9), 0.0   ;;  %v846_v16 = vmov (!%p167_p9), 3  }
   0xf   : > { %254 = vperm.xlu1 (!%p167_p9), %768, %v202_v0   ;;  %208 = vperm.xlu0 (!%p167_p9), %767, %v202_v0   ;;  %v942_v8 = vshrl.u32 (!%p167_p9), %v227_v4, 7  ;;  %vm355_vm3 = vcmask (!%p167_p9), 261120   ;;  %s189_s7 = sand.u32 (!%p167_p9), 1, %s832_s16  }
  0x10   : > { %432 = vmatprep.mubr.f32.mxu0 (!%p167_p9), %v845_v15  ;;  %537 = vmatprep.mubr.f32.mxu1 (!%p167_p9), %v845_v15  ;;  %s688_s8 = sshll.u32 (!%p167_p9), %s189_s7, 2  ;;  %s611_s20 = scalar_lea.sflag (!%p167_p9), [#allocation3], %s189_s7 }
  0x11   : > { %v233_v11 = vsub.s32 (!%p167_p9), 2, %v942_v8  ;;  %v954_v20 = vsub.s32 (!%p167_p9), 0, %v942_v8  ;;  %v271_v22 = vsub.s32 (!%p167_p9), 1, %v942_v8  ;;  %v275_v23 = vsub.s32 (!%p167_p9), 3, %v942_v8  ;;  %s191_s10 = scalar_lea.vmem (!%p167_p9), [#allocation2], %s688_s8 }
  0x12   : > { %s625_s11 = sshll.u32 (!%p167_p9), %s191_s10, 4  ;;  %s998_s11 = int_to_ptr.vmem [resolvable:$true] %s625_s11 }
  0x13   : > { %258 = vperm.xlu1 (!%p167_p9), %768, %v203_v3   ;;  %213 = vperm.xlu0 (!%p167_p9), %767, %v203_v3   ;;  %s778_s22 = scalar_lea.vmem (!%p167_p9), %s998_s11, 64 }
  0x14   : > { %p779_p11 = scmp.ne.s32.totalorder (!%p167_p9), %s998_s11, %s778_s22 }
  0x15   : > { %s1050_s27 = smov (!%p193_p10, %s689_s27), 3 }
  0x16   : > { %s690_s6 = sshll.u32 %s1050_s27, 1  ;;  %p780_p12 = pnand %p779_p11, %p913_p5 }
  0x17   : > { %s196_s9 = scalar_lea.vmem %s1038_s0, %s690_s6  ;;  %769 = vset.pattern.permute.xlu1 %v843_v2  ;;  %218 = vperm.xlu0 %767, %v204_v6  }
  0x18   : > { %v933_v5 = vld [vmem:[%s196_s9] sm:$0xf]  ;;  %223 = vperm.xlu1 %769, %v205_v7   ;;  %s704_s9 = sshll.u32 %s896_s19, 6  ;;  %p781_p13 = pneg %p780_p12 }
  0x19   : > { %vm560_vm0 = vcmp.lt.f32.partialorder %v933_v5, 0.0  ;;  %v200_v17 = vmul.f32 0.03125, %v933_v5  ;;  %s996_s14 = scalar_lea.hbm %s1042_s4, %s704_s9  ;;  %s849_s19 = smov [#allocation2]  }
  0x1a   : > { %v561_v9 = vsel %vm560_vm0, 1, %v843_v2  ;;  %s782_s23 = sshll.u32 %s849_s19, 4  ;;  %s783_s23 = int_to_ptr.vmem [resolvable:$false] %s782_s23 }
  0x1b   : > { %v697_v10 = vrot.slane %v561_v9, 9  ;;  %770 = vset.pattern.permute.xlu0 %v842_v1  ;;  %v691_v21 = vadd.f32 -1.0, %v200_v17  ;;  %s784_s27 = scalar_lea.vmem %s783_s23, 128  ;;  %p785_p0 = scmp.lt.s32.totalorder %s998_s11, %s783_s23 }
  0x1c   : > { %771 = vset.pattern.permute.xlu1 %v842_v1  ;;  %262 = vperm.xlu0 %770, %v204_v6   ;;  %p786_p1 = scmp.lt.s32.totalorder %s784_s27, %s778_s22 }
  0x1d   : > { %vm564_vm1 = vcmp.ne.s32.totalorder %v697_v10, 0  ;;  %266 = vperm.xlu1 %771, %v205_v7   ;;  %v272_v26 = vrot.slane %v691_v21, %v271_v22  ;;  %v276_v27 = vrot.slane %v691_v21, %v275_v23  ;;  %v230_v28 = vrot.slane %v691_v21, %v954_v20 }
  0x1e   : > { %vm565_vm2 = vmand %vm560_vm0, %vm564_vm1  ;;  %v234_v29 = vrot.slane %v691_v21, %v233_v11  ;;  %p787_p2 = por %p786_p1, %p785_p0 }
  0x1f   : > { %v945_v12 = vsel %vm565_vm2, 1, %v843_v2  ;;  %v282_v32 = vrot.slane %v272_v26, %v271_v22  ;;  %v286_v33 = vrot.slane %v276_v27, %v271_v22  ;;  %v240_v34 = vrot.slane %v230_v28, %v954_v20  ;;  %v335_v28 = vld [vmem:[%s1040_s2] sm:$0xff] }
  0x20   : > { %v948_v13 = vrot.slane %v945_v12, %v233_v11  ;;  %773 = vset.pattern.permute.xlu0 %v844_v14  ;;  %v244_v35 = vrot.slane %v234_v29, %v954_v20  ;;  %v336_v29 = vld [vmem:[%s1040_s2 + $0x8] sm:$0xff]  ;;  %p788_p3 = pnand %p787_p2, %p781_p13 }
  0x21   : > { %772 = vset.pattern.permute.xlu1 %v844_v14  ;;  %308 = vperm.xlu0 %773, %v203_v3  }
  0x22   : > { %304 = vperm.xlu1 %772, %v202_v0  }
  0x25   : > { %774 = vset.pattern.permute.xlu0 %v846_v16 }
  0x26   : > { %312 = vperm.xlu1 %772, %v204_v6   ;;  %340 = vperm.xlu0 %774, %v202_v0  }
  0x2a   : > { %316 = vperm.xlu1 %772, %v205_v7   ;;  %352 = vperm.xlu0 %774, %v205_v7  }
  0x2e   : > { %775 = vset.pattern.permute.xlu1 %v846_v16 }
  0x2f   : > { %344 = vperm.xlu1 %775, %v203_v3  }
  0x33   : > { %348 = vperm.xlu1 %775, %v204_v6  }
  0x8e   : > { %v255_v18 = vpop.permute.xlu1 %254  ;;  %v209_v19 = vpop.permute.xlu0 %208 }
  0x8f   : > { %v287_v41 = vmul.f32 %v282_v32, %v255_v18  ;;  %v288_v42 = vmul.f32 %v286_v33, %v255_v18  ;;  %v245_v43 = vmul.f32 %v240_v34, %v209_v19  ;;  %v246_v44 = vmul.f32 %v244_v35, %v209_v19 }
  0x91   : > { %v295_v49 = vadd.f32 %v287_v41, %v245_v43  ;;  %v296_v50 = vadd.f32 %v288_v42, %v246_v44 }
  0x92   : > { %v259_v24 = vpop.permute.xlu1 %258  ;;  %v214_v25 = vpop.permute.xlu0 %213 }
  0x93   : > { %v289_v36 = vmul.f32 %v282_v32, %v259_v24  ;;  %v290_v37 = vmul.f32 %v286_v33, %v259_v24  ;;  %v247_v38 = vmul.f32 %v240_v34, %v214_v25  ;;  %v248_v39 = vmul.f32 %v244_v35, %v214_v25 }
  0x95   : > { %v297_v46 = vadd.f32 %v289_v36, %v247_v38  ;;  %v298_v47 = vadd.f32 %v290_v37, %v248_v39 }
  0x96   : > { %v219_v30 = vpop.permute.xlu0 %218 }
  0x97   : > { %v224_v31 = vpop.permute.xlu1 %223  ;;  %v249_v58 = vmul.f32 %v240_v34, %v219_v30  ;;  %v250_v59 = vmul.f32 %v244_v35, %v219_v30  ;;  %v337_v30 = vld [vmem:[%s1040_s2 + $0x10] sm:$0xff] }
  0x98   : > { %v251_v2 = vmul.f32 %v240_v34, %v224_v31  ;;  %v252_v3 = vmul.f32 %v244_v35, %v224_v31  ;;  %v338_v31 = vld [vmem:[%s1040_s2 + $0x18] sm:$0xff] }
  0x9b   : > { %v263_v40 = vpop.permute.xlu0 %262 }
  0x9c   : > { %v267_v45 = vpop.permute.xlu1 %266  ;;  %v291_v54 = vmul.f32 %v282_v32, %v263_v40  ;;  %v292_v55 = vmul.f32 %v286_v33, %v263_v40 }
  0x9d   : > { %v293_v62 = vmul.f32 %v282_v32, %v267_v45  ;;  %v294_v63 = vmul.f32 %v286_v33, %v267_v45  ;;  %v465_v32 = vld [vmem:[%s1041_s3] sm:$0x3]  ;;  %v847_v33 = vmov 32  }
  0x9e   : > { %v299_v6 = vadd.f32 %v291_v54, %v249_v58  ;;  %v300_v7 = vadd.f32 %v292_v55, %v250_v59  ;;  %776 = vset.pattern.permute.xlu1 %v847_v33  ;;  %777 = vset.pattern.permute.xlu0 %v847_v33 }
  0x9f   : > { %v301_v16 = vadd.f32 %v293_v62, %v251_v2  ;;  %v302_v17 = vadd.f32 %v294_v63, %v252_v3  ;;  %468 = vperm.xlu1 %776, %v465_v32  }
  0xa0   : > { %v309_v48 = vpop.permute.xlu0 %308 }
  0xa1   : > { %v321_v51 = vadd.f32 %v309_v48, %v297_v46  ;;  %v322_v52 = vadd.f32 %v309_v48, %v298_v47  ;;  %v305_v53 = vpop.permute.xlu1 %304 }
  0xa2   : > { %v319_v56 = vadd.f32 %v305_v53, %v295_v49  ;;  %v320_v57 = vadd.f32 %v305_v53, %v296_v50 }
  0xa3   : > { %v329_v60 = vmax.f32 %v321_v51, 0.0  ;;  %v330_v61 = vmax.f32 %v322_v52, 0.0 }
  0xa4   : > { %v327_v0 = vmax.f32 %v319_v56, 0.0  ;;  %v328_v1 = vmax.f32 %v320_v57, 0.0 }
  0xa5   : > { %v313_v4 = vpop.permute.xlu1 %312  ;;  %v341_v34 = vpop.permute.xlu0 %340 }
  0xa6   : > { %v705_v9 = vpack.c.bf16 %v330_v61, %v328_v1  ;;  %v707_v10 = vpack.c.bf16 %v329_v60, %v327_v0  ;;  %v323_v11 = vadd.f32 %v313_v4, %v299_v6  ;;  %v324_v14 = vadd.f32 %v313_v4, %v300_v7 }
  0xa7   : > { %v848_v1 = vmov 1983009808  }
  0xa8   : > { %706 = vmatprep.subr.bf16.mxu0 %v705_v9  ;;  %v331_v22 = vmax.f32 %v323_v11, 0.0  ;;  %v332_v23 = vmax.f32 %v324_v14, 0.0  ;;  %v550_v2 = vunpack.c.l.s4 %v848_v1 }
  0xa9   : > { %v317_v18 = vpop.permute.xlu1 %316  ;;  %708 = vmatpush1.bf16.msra.mxu0 %v707_v10  ;;  %v353_v53 = vpop.permute.xlu0 %352 }
  0xaa   : > { %v325_v19 = vadd.f32 %v317_v18, %v301_v16  ;;  %v326_v21 = vadd.f32 %v317_v18, %v302_v17  ;;  %v551_v6 = vunpack.c.0.s8 %v550_v2  ;;  %v570_v18 = vrot.slane %v945_v12, %v954_v20 }
  0xac   : > { %v333_v24 = vmax.f32 %v325_v19, 0.0  ;;  %v334_v25 = vmax.f32 %v326_v21, 0.0  ;;  %v554_v16 = vsub.s32 %v551_v6, %v942_v8 }
  0xae   : > { %v709_v26 = vpack.c.bf16 %v334_v25, %v332_v23  ;;  %v711_v27 = vpack.c.bf16 %v333_v24, %v331_v22  ;;  %v345_v37 = vpop.permute.xlu1 %344  ;;  %v578_v22 = vrot.slane %v570_v18, %v954_v20  ;;  %v582_v24 = vrot.slane %v948_v13, %v954_v20 }
  0xb0   : > { %710 = vmatprep.subr.bf16.mxu0 %v709_v26  ;;  %vm583_vm4 = vcmp.eq.s32.totalorder %v578_v22, 1  ;;  %vm584_vm5 = vcmp.eq.s32.totalorder %v582_v24, 1 }
  0xb1   : > { %712 = vmatpush1.bf16.msra.mxu0 %v711_v27 }
  0xb2   : > { %v349_v47 = vpop.permute.xlu1 %348 }
  0xb4   : > { %692 = vmatmul.mubr.msk.f32.vlgmr.msra.gmra.mrb[0].mxu0 %vm355_vm3, %v335_v28 }
  0xb5   : > { %438 = vmatprep.mubr.f32.mxu0 %v845_v15 }
  0xb8   : > { %693 = vmatmul.mubr.msk.f32.gmra.mrb[2].mxu0 %vm355_vm3, %v336_v29 }
  0xb9   : > { %444 = vmatprep.mubr.f32.mxu0 %v845_v15 }
  0xbc   : > { %694 = vmatmul.mubr.msk.f32.gmra.mrb[4].mxu0 %vm355_vm3, %v337_v30 }
  0xbd   : > { %450 = vmatprep.mubr.f32.mxu0 %v845_v15 }
  0xc0   : > { %695 = vmatmul.mubr.msk.f32.gmra.mrb[6].mxu0 %vm355_vm3, %v338_v31 }
 0x11e   : > { %v469_v3 = vpop.permute.xlu1 %468 }
 0x187   : > { %v434_v35 = vpop.f32.mrb[0].mxu0 }
 0x188   : > { %v436_v36 = vpop.f32.mrb[1].mxu0  ;;  %v435_v38 = vadd.f32 %v434_v35, %v341_v34 }
 0x189   : > { %v437_v15 = vadd.f32 %v436_v36, %v341_v34 }
 0x18a   : > { %v457_v43 = vmax.f32 %v435_v38, 0.0 }
 0x18b   : > { %v440_v39 = vpop.f32.mrb[2].mxu0  ;;  %v458_v45 = vmax.f32 %v437_v15, 0.0 }
 0x18c   : > { %v441_v40 = vadd.f32 %v440_v39, %v345_v37  ;;  %v442_v41 = vpop.f32.mrb[3].mxu0 }
 0x18d   : > { %v443_v42 = vadd.f32 %v442_v41, %v345_v37 }
 0x18e   : > { %v459_v44 = vmax.f32 %v441_v40, 0.0 }
 0x18f   : > { %v460_v46 = vmax.f32 %v443_v42, 0.0  ;;  %v446_v48 = vpop.f32.mrb[4].mxu0 }
 0x190   : > { %v448_v49 = vpop.f32.mrb[5].mxu0  ;;  %v715_v50 = vpack.c.bf16 %v459_v44, %v457_v43  ;;  %v447_v52 = vadd.f32 %v446_v48, %v349_v47 }
 0x191   : > { %v713_v51 = vpack.c.bf16 %v460_v46, %v458_v45  ;;  %v449_v54 = vadd.f32 %v448_v49, %v349_v47 }
 0x192   : > { %v461_v59 = vmax.f32 %v447_v52, 0.0 }
 0x193   : > { %v452_v55 = vpop.f32.mrb[6].mxu0  ;;  %714 = vmatprep.subr.bf16.mxu1 %v713_v51  ;;  %v462_v61 = vmax.f32 %v449_v54, 0.0 }
 0x194   : > { %v453_v56 = vadd.f32 %v452_v55, %v353_v53  ;;  %v454_v57 = vpop.f32.mrb[7].mxu0  ;;  %716 = vmatpush1.bf16.msra.mxu1 %v715_v50 }
 0x195   : > { %v455_v58 = vadd.f32 %v454_v57, %v353_v53 }
 0x196   : > { %v463_v60 = vmax.f32 %v453_v56, 0.0 }
 0x197   : > { %v464_v62 = vmax.f32 %v455_v58, 0.0 }
 0x198   : > { %v719_v63 = vpack.c.bf16 %v463_v60, %v461_v59 }
 0x199   : > { %v717_v0 = vpack.c.bf16 %v464_v62, %v462_v61 }
 0x19b   : > { %718 = vmatprep.subr.bf16.mxu1 %v717_v0 }
 0x19c   : > { %720 = vmatpush1.bf16.msra.mxu1 %v719_v63 }
 0x19f   : > { %696 = vmatmul.mubr.msk.f32.vlgmr.msra.gmra.mrb[0].mxu1 %vm355_vm3, %v465_v32 }
 0x272   : > { %v539_v4 = vpop.f32.mrb[0].mxu1 }
 0x273   : > { %v540_v7 = vadd.f32 %v539_v4, %v469_v3  ;;  %v541_v9 = vpop.f32.mrb[1].mxu1 }
 0x274   : > { %v542_v10 = vadd.f32 %v541_v9, %v469_v3 }
 0x275   : > { %v544_v11 = vmul.f32 10.0, %v540_v7 }
 0x276   : > { %v545_v14 = vmul.f32 10.0, %v542_v10 }
 0x278   : > { %v548_v17 = vcombine.low %v544_v11, %v545_v14 }
 0x27a   : > { %v555_v19 = vrot.slane %v548_v17, %v554_v16 }
 0x27c   : > { %v557_v21 = vadd.f32 %v555_v19, %v933_v5 }
 0x27e   : > { %v558_v23 = vmax.f32 %v557_v21, 0.0 }
 0x280   : > { %v559_v25 = vmin.f32 %v558_v23, 64.0 }
 0x282   : > { %v592_v8 = vrot.slane %v559_v25, %v554_v16 }
 0x284   : > { %v593_v26 = vcombine.high %v592_v8, %v592_v8  ;;  %v596_v27 = vsel %vm583_vm4, -1.0, %v592_v8 }
 0x286   : > { %v597_v12 = vsel %vm584_vm5, -1.0, %v593_v26 }
 0x287   : > { %v600_v28 = vcombine.low %v596_v27, %v597_v12 }
 0x289   : > { %698 = vst.sshfl [vmem:[%s191_s10] sm:$0x33 pattern:$0x76325410] %v600_v28 }
 0x28a   : > { %791 = shalt.err (!%p788_p3)
}
 0x28b   : > { %s792_s28 = scalar_lea.hbm %s996_s14, 64  ;;  %s796_s5 = scalar_lea.hbm %s1042_s4, 128 }
 0x28c   : > { %p793_p4 = scmp.ne.s32.totalorder %s996_s14, %s792_s28  ;;  %p797_p9 = scmp.lt.u32.totalorder %s996_s14, %s1042_s4 }
 0x28d   : > { %p798_p10 = scmp.lt.u32.totalorder %s796_s5, %s792_s28  ;;  %p800_p12 = scmp.lt.u32.totalorder %s792_s28, %s996_s14 }
 0x28e   : > { %p794_p7 = pnand %p793_p4, %p913_p5 }
 0x28f   : > { %p799_p11 = por %p798_p10, %p797_p9 }
 0x290   : > { %p795_p8 = pneg %p794_p7 }
 0x291   : > { %p801_p13 = por %p800_p12, %p799_p11 }
 0x293   : > { %p802_p0 = pnand %p801_p13, %p795_p8 }
 0x295   : > { %805 = shalt.err (!%p802_p0)
}
 0x296   : > { %721 = dma.vmem_to_hbm [thread:$0]  (%p913_p5), %s998_s11, 64, %s996_s14, %s611_s20  }
 0x297 PF: > { %p727_p1 = scmp.ge.s32.totalorder %s840_s18, 2  ;;  %s637_s8 = sand.u32 1, %s828_s15  }
 0x298   : > { %s638_s9 = scalar_lea.sflag [#allocation3], %s637_s8 }
 0x299   : > { %p724_p2 = pnand %p727_p1, %p917_p6 }
 0x29b   : > { %823 = dma.done.wait (!%p724_p2), %s638_s9, 64  }
 0x29c   : > { %825 = vsyncadd (!%p724_p2), %s638_s9, 4294967232  ;;  %p14_p3 = scmp.ge.s32.totalorder %s900_s21, 4   ;;  %s1045_s15 = smov %s832_s16 }
 0x29d   : > { %s1046_s16 = smov %s836_s17  ;;  %s1047_s17 = smov %s911_s24 }
 0x29e   : > { %s1048_s18 = smov %s900_s21  ;;  %16 = sbr.rel (!%p14_p3) target bundleno = 3 (0x3), region = 71 }
 0x2a5   :  { %643 = vsyncpa [#allocation3], 1 }
 0x2a6   :  { %645 = vsyncpa [#allocation3 + $0x1], 1 }

</bundles_post_ra>
